<compile_context>
chip_gen: v7x
topology: tpu7x:2x2x1
jax: 0.10.0
libtpu: 0.0.40
codegen_flags: <defaults>
</compile_context>

<pallas_src>
import jax
import jax.numpy as jnp
import numpy as np
from jax.experimental import pallas as pl
from jax.experimental.pallas import tpu as pltpu

BN_EPS = 1e-5
# Conservative across v5e/v6e/v7x default scoped-VMEM limits (16/32/32 MiB).
_SMALL_PATH_MAX_VMEM = 12 * 1024 * 1024


def _round_up(x, m):
    return ((x + m - 1) // m) * m


def _finish(acc, ph_ref, w2_ref, b2_ref, inv_n):
    """Bias + ReLU + folded BatchNorm (batch stats) + Linear 2 on the f32 accumulation."""
    b1 = ph_ref[0:1, :]
    gamma = ph_ref[1:2, :]
    beta = ph_ref[2:3, :]

    h = jnp.maximum(acc + b1, 0.0)                       # (B, d_hidden_p), f32

    # one pass over h for both moments; fold BN into per-feature scale/shift
    s = jnp.sum(h, axis=0, keepdims=True)
    ssq = jnp.sum(h * h, axis=0, keepdims=True)
    mean = s * inv_n
    var = jnp.maximum(ssq * inv_n - mean * mean, 0.0)    # biased variance
    scale = gamma * jax.lax.rsqrt(var + BN_EPS)          # rsqrt on the EUP
    shift = beta - mean * scale

    h_bn = (h * scale + shift).astype(w2_ref.dtype)      # single mul+add pass over h
    return jnp.dot(h_bn, w2_ref[...],
                   preferred_element_type=jnp.float32) + b2_ref[...]


def _make_resident_kernel(inv_n):
    """Whole-problem-resident kernel (no grid): one MXU pass per linear layer."""
    def kernel(x_ref, w1_ref, w2_ref, ph_ref, b2_ref, out_ref):
        acc = jnp.dot(x_ref[...], w1_ref[...], preferred_element_type=jnp.float32)
        out_ref[...] = _finish(acc, ph_ref, w2_ref, b2_ref, inv_n)
    return kernel


def _make_ktiled_kernel(inv_n, n_k):
    """Grid over the d_in (K) reduction of Linear 1; epilogue on the last step."""
    def kernel(x_ref, w1_ref, w2_ref, ph_ref, b2_ref, out_ref, acc_ref):
        k = pl.program_id(0)

        @pl.when(k == 0)
        def _():
            acc_ref[...] = jnp.zeros_like(acc_ref)

        acc_ref[...] += jnp.dot(x_ref[...], w1_ref[...],
                                preferred_element_type=jnp.float32)

        @pl.when(k == n_k - 1)
        def _():
            out_ref[...] = _finish(acc_ref[...], ph_ref, w2_ref, b2_ref, inv_n)
    return kernel


def prepare_params(params, compute_dtype=jnp.float32):
    """One-time (per-model) padding / packing / casting.

    Keep this OUT of the per-call hot path: zero-pad all feature dims to multiples
    of 128 (lane-dense vregs, unmasked output vst), pack b1/gamma/beta into one
    (3, d_hidden_p) array, and optionally cast weights to bf16.
    Padded lanes of W1/W2/gamma/beta/b1/b2 are zero, so padded features stay
    exactly 0 through the whole pipeline (numerically exact).
    """
    w1 = jnp.asarray(params["w1"])                       # (d_in, d_hidden)  = W1^T
    w2 = jnp.asarray(params["w2"])                       # (d_hidden, d_out) = W2^T
    d_in, d_hidden = w1.shape
    d_out = w2.shape[1]

    d_in_p = _round_up(d_in, 128)
    d_hidden_p = _round_up(d_hidden, 128)
    d_out_p = _round_up(d_out, 128)

    w1_p = jnp.pad(w1.astype(jnp.float32),
                   ((0, d_in_p - d_in), (0, d_hidden_p - d_hidden))).astype(compute_dtype)
    w2_p = jnp.pad(w2.astype(jnp.float32),
                   ((0, d_hidden_p - d_hidden), (0, d_out_p - d_out))).astype(compute_dtype)

    ph = jnp.zeros((3, d_hidden_p), jnp.float32)
    ph = ph.at[0, :d_hidden].set(jnp.asarray(params["b1"], jnp.float32).reshape(-1))
    ph = ph.at[1, :d_hidden].set(jnp.asarray(params["gamma"], jnp.float32).reshape(-1))
    ph = ph.at[2, :d_hidden].set(jnp.asarray(params["beta"], jnp.float32).reshape(-1))
    b2_p = jnp.zeros((1, d_out_p), jnp.float32)
    b2_p = b2_p.at[0, :d_out].set(jnp.asarray(params["b2"], jnp.float32).reshape(-1))

    w1_p, w2_p, ph, b2_p = jax.device_put((w1_p, w2_p, ph, b2_p))
    return {
        "w1_p": w1_p, "w2_p": w2_p, "ph": ph, "b2_p": b2_p,
        "d_in": d_in, "d_hidden": d_hidden, "d_out": d_out,
        "d_in_p": d_in_p, "d_hidden_p": d_hidden_p, "d_out_p": d_out_p,
        "compute_dtype": compute_dtype,
    }


def mlp_from_latent_forward(inputs, prepared, key_name="latent_3d",
                            k_tile=None, slice_output=True):
    """Pallas-backed forward pass. Per-call work: reshape -> pallas_call -> slice."""
    latent = inputs[key_name]
    B = latent.shape[0]
    d_in, d_in_p = prepared["d_in"], prepared["d_in_p"]
    d_hidden_p = prepared["d_hidden_p"]
    d_out, d_out_p = prepared["d_out"], prepared["d_out_p"]
    cdt = prepared["compute_dtype"]
    itemsize = jnp.dtype(cdt).itemsize
    inv_n = 1.0 / float(B)

    x = latent.reshape(B, -1)                            # glue reshape in plain JAX
    assert x.shape[1] == d_in
    if x.dtype != jnp.dtype(cdt):
        x = x.astype(cdt)
    if d_in_p != d_in:                                   # skipped when already lane-dense
        x = jnp.pad(x, ((0, 0), (0, d_in_p - d_in)))

    w1_p, w2_p, ph, b2_p = (prepared["w1_p"], prepared["w2_p"],
                            prepared["ph"], prepared["b2_p"])

    flops = (2 * B * d_in_p * d_hidden_p + 2 * B * d_hidden_p * d_out_p
             + 10 * B * d_hidden_p)
    bytes_accessed = (itemsize * (B * d_in_p + d_in_p * d_hidden_p + d_hidden_p * d_out_p)
                      + 4 * (3 * d_hidden_p + d_out_p + B * d_out_p))
    cost = pl.CostEstimate(flops=flops, transcendentals=d_hidden_p,
                           bytes_accessed=bytes_accessed)

    # Whole-resident VMEM footprint (weights + activations + params, f32 intermediates).
    resident_bytes = (itemsize * (B * d_in_p + d_in_p * d_hidden_p + d_hidden_p * d_out_p)
                      + 4 * (B * d_hidden_p + B * d_out_p + 4 * d_hidden_p + d_out_p))

    if k_tile is None and resident_bytes <= _SMALL_PATH_MAX_VMEM:
        # Fast path: everything resident, no grid, no per-step overhead.
        vmem_spec = pl.BlockSpec(memory_space=pltpu.MemorySpace.VMEM)
        out_p = pl.pallas_call(
            _make_resident_kernel(inv_n),
            out_shape=jax.ShapeDtypeStruct((B, d_out_p), jnp.float32),
            in_specs=[vmem_spec] * 5,
            out_specs=vmem_spec,
            cost_estimate=cost,
        )(x, w1_p, w2_p, ph, b2_p)
    else:
        # Scaling path: pipeline the W1/x streaming over the d_in reduction.
        if k_tile is None:
            k_tile = 512 if d_in_p % 512 == 0 else (256 if d_in_p % 256 == 0 else 128)
        assert d_in_p % k_tile == 0
        n_k = d_in_p // k_tile

        tile_bytes = (2 * itemsize * (B * k_tile + k_tile * d_hidden_p)   # double-buffered tiles
                      + itemsize * d_hidden_p * d_out_p
                      + 4 * (B * d_hidden_p + B * d_out_p + 4 * d_hidden_p + d_out_p))
        vmem_limit = int(min(100 * 1024 * 1024, 2 * tile_bytes + (2 << 20)))

        out_p = pl.pallas_call(
            _make_ktiled_kernel(inv_n, n_k),
            out_shape=jax.ShapeDtypeStruct((B, d_out_p), jnp.float32),
            grid_spec=pltpu.PrefetchScalarGridSpec(
                num_scalar_prefetch=0,
                grid=(n_k,),
                in_specs=[
                    pl.BlockSpec((B, k_tile), lambda k: (0, k)),
                    pl.BlockSpec((k_tile, d_hidden_p), lambda k: (k, 0)),
                    pl.BlockSpec((d_hidden_p, d_out_p), lambda k: (0, 0)),
                    pl.BlockSpec((3, d_hidden_p), lambda k: (0, 0)),
                    pl.BlockSpec((1, d_out_p), lambda k: (0, 0)),
                ],
                out_specs=pl.BlockSpec((B, d_out_p), lambda k: (0, 0)),
                scratch_shapes=[pltpu.VMEM((B, d_hidden_p), jnp.float32)],
            ),
            compiler_params=pltpu.CompilerParams(
                dimension_semantics=("arbitrary",),
                vmem_limit_bytes=vmem_limit,
            ),
            cost_estimate=cost,
        )(x, w1_p, w2_p, ph, b2_p)

    if slice_output and d_out != d_out_p:
        out = out_p[:, :d_out]
    else:
        out = out_p
    return {"3D": out, "latent_3d": latent}


def init_params(key, d_in, d_hidden, d_out):
    """Deterministic synthetic parameters (PyTorch-Linear-style uniform init)."""
    k1, k2, k3, k4 = jax.random.split(key, 4)
    lim1 = 1.0 / np.sqrt(d_in)
    lim2 = 1.0 / np.sqrt(d_hidden)
    return {
        # stored already transposed: (in, out)
        "w1": jax.random.uniform(k1, (d_in, d_hidden), jnp.float32, -lim1, lim1),
        "b1": jax.random.uniform(k2, (1, d_hidden), jnp.float32, -lim1, lim1),
        "gamma": jnp.ones((1, d_hidden), jnp.float32),   # BatchNorm1d affine defaults
        "beta": jnp.zeros((1, d_hidden), jnp.float32),
        "w2": jax.random.uniform(k3, (d_hidden, d_out), jnp.float32, -lim2, lim2),
        "b2": jax.random.uniform(k4, (1, d_out), jnp.float32, -lim2, lim2),
    }


def reference_forward(inputs, params, key_name="latent_3d"):
    """Pure-JAX reference for correctness checking."""
    latent = inputs[key_name]
    B = latent.shape[0]
    x = latent.reshape(B, -1).astype(jnp.float32)
    h = jnp.maximum(x @ params["w1"] + params["b1"], 0.0)
    mean = jnp.mean(h, axis=0, keepdims=True)
    var = jnp.mean((h - mean) ** 2, axis=0, keepdims=True)
    h = (h - mean) / jnp.sqrt(var + BN_EPS) * params["gamma"] + params["beta"]
    out = h @ params["w2"] + params["b2"]
    return {"3D": out, "latent_3d": latent}


if __name__ == "__main__":
    # latent_3d: (batch=8, channels=4, 8, 8) -> d_in = 256
    B, C, H, W = 8, 4, 8, 8
    d_in = C * H * W
    d_hidden = 64
    d_out = 51  # e.g. 17 joints x 3

    root = jax.random.PRNGKey(0)
    k_x, k_p = jax.random.split(root)
    latent = jax.random.normal(k_x, (B, C, H, W), jnp.float32)
    params = init_params(k_p, d_in, d_hidden, d_out)
    inputs = {"latent_3d": latent}

    ref = reference_forward(inputs, params)

    # One-time parameter preparation (hoisted out of the per-call hot path).
    prepared = prepare_params(params)

    # 1) whole-resident fast path (no grid)
    out = mlp_from_latent_forward(inputs, prepared)
    jax.block_until_ready(out["3D"])
    np.testing.assert_allclose(np.asarray(out["3D"]), np.asarray(ref["3D"]),
                               rtol=1e-4, atol=1e-4)
    assert out["3D"].shape == (B, d_out)
    assert out["latent_3d"].shape == (B, C, H, W)

    # 2) K-tiled pipelined path (what large d_in auto-selects); forced here to verify it.
    out_t = mlp_from_latent_forward(inputs, prepared, k_tile=128)
    jax.block_until_ready(out_t["3D"])
    np.testing.assert_allclose(np.asarray(out_t["3D"]), np.asarray(ref["3D"]),
                               rtol=1e-4, atol=1e-4)

    # 3) bf16-weight variant (bandwidth-bound configs) — sanity run, not bit-exact vs f32.
    prepared_bf16 = prepare_params(params, compute_dtype=jnp.bfloat16)
    out_bf = mlp_from_latent_forward(inputs, prepared_bf16)
    jax.block_until_ready(out_bf["3D"])
    assert out_bf["3D"].shape == (B, d_out)
    assert bool(jnp.all(jnp.isfinite(out_bf["3D"])))

    print("KERNEL_OK")
</pallas_src>

<mosaic_0001>
module attributes {stable_mosaic.version = 11 : i64} {
  func.func @kernel(%arg0: memref<8x256xf32, #tpu.memory_space<vmem>>, %arg1: memref<256x128xf32, #tpu.memory_space<vmem>>, %arg2: memref<128x128xf32, #tpu.memory_space<vmem>>, %arg3: memref<3x128xf32, #tpu.memory_space<vmem>>, %arg4: memref<1x128xf32, #tpu.memory_space<vmem>>, %arg5: memref<8x128xf32, #tpu.memory_space<vmem>>) attributes {dimension_semantics = [], scalar_prefetch = 0 : i64, scratch_operands = 0 : i64, tpu.core_type = #tpu.core_type<tc>} {
    %c0 = arith.constant 0 : index
    %c0_0 = arith.constant 0 : index
    %0 = vector.load %arg0[%c0, %c0_0] : memref<8x256xf32, #tpu.memory_space<vmem>>, vector<8x256xf32>
    %c0_1 = arith.constant 0 : index
    %c0_2 = arith.constant 0 : index
    %1 = vector.load %arg1[%c0_1, %c0_2] : memref<256x128xf32, #tpu.memory_space<vmem>>, vector<256x128xf32>
    %cst = arith.constant dense<0.000000e+00> : vector<8x128xf32>
    %2 = tpu.matmul %0, %1, %cst {dimension_numbers = #tpu.dot_dimension_numbers<[1], [0], [0], [1], [0, 0, 1, 1], [], []>} : vector<8x256xf32>, vector<256x128xf32>, vector<8x128xf32> -> vector<8x128xf32>
    %c0_3 = arith.constant 0 : index
    %c0_4 = arith.constant 0 : index
    %3 = vector.load %arg3[%c0_3, %c0_4] : memref<3x128xf32, #tpu.memory_space<vmem>>, vector<1x128xf32>
    %c1 = arith.constant 1 : index
    %c0_5 = arith.constant 0 : index
    %4 = vector.load %arg3[%c1, %c0_5] : memref<3x128xf32, #tpu.memory_space<vmem>>, vector<1x128xf32>
    %c2 = arith.constant 2 : index
    %c0_6 = arith.constant 0 : index
    %5 = vector.load %arg3[%c2, %c0_6] : memref<3x128xf32, #tpu.memory_space<vmem>>, vector<1x128xf32>
    %6 = vector.broadcast %3 : vector<1x128xf32> to vector<8x128xf32>
    %7 = arith.addf %2, %6 : vector<8x128xf32>
    %cst_7 = arith.constant 0.000000e+00 : f32
    %8 = vector.broadcast %cst_7 : f32 to vector<8x128xf32>
    %9 = arith.maximumf %7, %8 : vector<8x128xf32>
    %cst_8 = arith.constant dense<0.000000e+00> : vector<128xf32>
    %10 = vector.multi_reduction <add>, %9, %cst_8 [0] : vector<8x128xf32> to vector<128xf32>
    %11 = vector.shape_cast %10 : vector<128xf32> to vector<1x128xf32>
    %12 = arith.mulf %9, %9 : vector<8x128xf32>
    %cst_9 = arith.constant dense<0.000000e+00> : vector<128xf32>
    %13 = vector.multi_reduction <add>, %12, %cst_9 [0] : vector<8x128xf32> to vector<128xf32>
    %14 = vector.shape_cast %13 : vector<128xf32> to vector<1x128xf32>
    %cst_10 = arith.constant 1.250000e-01 : f32
    %15 = vector.broadcast %cst_10 : f32 to vector<1x128xf32>
    %16 = arith.mulf %11, %15 : vector<1x128xf32>
    %cst_11 = arith.constant 1.250000e-01 : f32
    %17 = vector.broadcast %cst_11 : f32 to vector<1x128xf32>
    %18 = arith.mulf %14, %17 : vector<1x128xf32>
    %19 = arith.mulf %16, %16 : vector<1x128xf32>
    %20 = arith.subf %18, %19 : vector<1x128xf32>
    %cst_12 = arith.constant 0.000000e+00 : f32
    %21 = vector.broadcast %cst_12 : f32 to vector<1x128xf32>
    %22 = arith.maximumf %20, %21 : vector<1x128xf32>
    %cst_13 = arith.constant 9.99999974E-6 : f32
    %23 = vector.broadcast %cst_13 : f32 to vector<1x128xf32>
    %24 = arith.addf %22, %23 : vector<1x128xf32>
    %25 = math.rsqrt %24 : vector<1x128xf32>
    %26 = arith.mulf %4, %25 : vector<1x128xf32>
    %27 = arith.mulf %16, %26 : vector<1x128xf32>
    %28 = arith.subf %5, %27 : vector<1x128xf32>
    %29 = vector.broadcast %26 : vector<1x128xf32> to vector<8x128xf32>
    %30 = arith.mulf %9, %29 : vector<8x128xf32>
    %31 = vector.broadcast %28 : vector<1x128xf32> to vector<8x128xf32>
    %32 = arith.addf %30, %31 : vector<8x128xf32>
    %c0_14 = arith.constant 0 : index
    %c0_15 = arith.constant 0 : index
    %33 = vector.load %arg2[%c0_14, %c0_15] : memref<128x128xf32, #tpu.memory_space<vmem>>, vector<128x128xf32>
    %cst_16 = arith.constant dense<0.000000e+00> : vector<8x128xf32>
    %34 = tpu.matmul %32, %33, %cst_16 {dimension_numbers = #tpu.dot_dimension_numbers<[1], [0], [0], [1], [0, 0, 1, 1], [], []>} : vector<8x128xf32>, vector<128x128xf32>, vector<8x128xf32> -> vector<8x128xf32>
    %c0_17 = arith.constant 0 : index
    %c0_18 = arith.constant 0 : index
    %35 = vector.load %arg4[%c0_17, %c0_18] : memref<1x128xf32, #tpu.memory_space<vmem>>, vector<1x128xf32>
    %36 = vector.broadcast %35 : vector<1x128xf32> to vector<8x128xf32>
    %37 = arith.addf %34, %36 : vector<8x128xf32>
    %c0_19 = arith.constant 0 : index
    %c0_20 = arith.constant 0 : index
    %38 = vector.load %arg5[%c0_19, %c0_20] : memref<8x128xf32, #tpu.memory_space<vmem>>, vector<8x128xf32>
    tpu.vector_store %arg5[%c0_19, %c0_20], %37 {strides = array<i32>} : memref<8x128xf32, #tpu.memory_space<vmem>>, vector<8x128xf32>,
    return
  }
}

</mosaic_0001>

<bundles_post_ra>
// kernel: tpu_custom_call.1
= control target key start
LH: loop header
LB: loop body
LE: loop exit
PB: predicated region body
PF: predicated region fallthrough
CT: control target
= control target key end

     0   :  { %10 = vsyncpa [#allocation3], 0  ;;  %s670_s0 = inlined_call_operand.hbm [shape: f32[8,256], index: 0, kind: input, shape index: {}]   ;;  %s671_s1 = inlined_call_operand.hbm [shape: f32[256,128], index: 1, kind: input, shape index: {}]   ;;  %s672_s2 = inlined_call_operand.hbm [shape: f32[128,128], index: 2, kind: input, shape index: {}]   ;;  %s673_s3 = inlined_call_operand.vmem [shape: f32[3,128], index: 3, kind: input, shape index: {}]   ;;  %s674_s4 = inlined_call_operand.vmem [shape: f32[1,128], index: 4, kind: input, shape index: {}]   ;;  %s675_s5 = inlined_call_operand.hbm [shape: f32[8,128], index: 5, kind: output, shape index: {}]  }
   0x1   :  { %11 = vsyncpa [#allocation6], 0 }
   0x2   :  { %12 = vsyncpa [#allocation4], 0  ;;  %s565_s18 = smov [#allocation5]   ;;  %s471_s22 = scalar_lea.hbm %s671_s1, 4096 }
   0x3   :  { %s28_s19 = sshll.u32 %s565_s18, 4  ;;  %p472_p0 = scmp.ne.s32.totalorder %s671_s1, %s471_s22  ;;  %s29_s19 = int_to_ptr.vmem [resolvable:$true] %s28_s19 }
   0x4   :  { %p475_p1 = scmp.lt.u32.totalorder %s471_s22, %s671_s1 }
   0x6   :  { %p477_p2 = pnand %p475_p1, %p472_p0 }
   0x8   :  { %480 = shalt.err (!%p477_p2)
}
   0x9   :  { %s481_s27 = scalar_lea.vmem %s29_s19, 4096  ;;  %p486_p4 = scmp.lt.s32.totalorder %s29_s19, %s29_s19 }
   0xa   :  { %p482_p3 = scmp.ne.s32.totalorder %s29_s19, %s481_s27  ;;  %p487_p5 = scmp.lt.s32.totalorder %s481_s27, %s481_s27 }
   0xc   :  { %p488_p6 = por %p487_p5, %p486_p4 }
   0xe   :  { %p489_p7 = pnand %p488_p6, %p482_p3 }
  0x10   :  { %492 = shalt.err (!%p489_p7)
}
  0x11   :  { %s566_s28 = smov 128   ;;  %s567_s29 = smov 8  }
  0x12   :  { %34 = dma.hbm_to_vmem [thread:$0]  %s671_s1, 4096, %s29_s19, [#allocation6], %s566_s28, %s566_s28, %s567_s29  }
  0x13   :  { %s568_s7 = smov [#allocation2]   ;;  %s569_s9 = smov [#allocation7]  }
  0x14   :  { %s19_s8 = sshll.u32 %s568_s7, 4  ;;  %s40_s10 = sshll.u32 %s569_s9, 4  ;;  %s20_s8 = int_to_ptr.vmem [resolvable:$true] %s19_s8  ;;  %s41_s10 = int_to_ptr.vmem [resolvable:$true] %s40_s10 }
  0x15   :  { %s493_s13 = scalar_lea.hbm %s670_s0, 256 }
  0x16   :  { %p494_p8 = scmp.ne.s32.totalorder %s670_s0, %s493_s13  ;;  %p497_p9 = scmp.lt.u32.totalorder %s493_s13, %s670_s0 }
  0x18   :  { %p499_p10 = pnand %p497_p9, %p494_p8 }
  0x1a   :  { %502 = shalt.err (!%p499_p10)
}
  0x1b   :  { %s503_s1 = scalar_lea.vmem %s20_s8, 256  ;;  %p508_p12 = scmp.lt.s32.totalorder %s20_s8, %s20_s8 }
  0x1c   :  { %p504_p11 = scmp.ne.s32.totalorder %s20_s8, %s503_s1  ;;  %p509_p13 = scmp.lt.s32.totalorder %s503_s1, %s503_s1 }
  0x1e   :  { %p510_p0 = por %p509_p13, %p508_p12 }
  0x20   :  { %p511_p1 = pnand %p510_p0, %p504_p11 }
  0x22   :  { %514 = shalt.err (!%p511_p1)
}
  0x23   :  { %22 = dma.hbm_to_vmem [thread:$0]  %s670_s0, 256, %s20_s8, [#allocation3]  }
  0x24   :  { %s515_s22 = scalar_lea.hbm %s672_s2, 2048 }
  0x25   :  { %p516_p2 = scmp.ne.s32.totalorder %s672_s2, %s515_s22  ;;  %p519_p3 = scmp.lt.u32.totalorder %s515_s22, %s672_s2 }
  0x27   :  { %p521_p4 = pnand %p519_p3, %p516_p2 }
  0x29   :  { %524 = shalt.err (!%p521_p4)
}
  0x2a   :  { %s525_s27 = scalar_lea.vmem %s41_s10, 2048  ;;  %p530_p6 = scmp.lt.s32.totalorder %s41_s10, %s41_s10 }
  0x2b   :  { %p526_p5 = scmp.ne.s32.totalorder %s41_s10, %s525_s27  ;;  %p531_p7 = scmp.lt.s32.totalorder %s525_s27, %s525_s27 }
  0x2d   :  { %p532_p8 = por %p531_p7, %p530_p6 }
  0x2f   :  { %p533_p9 = pnand %p532_p8, %p526_p5 }
  0x31   :  { %536 = shalt.err (!%p533_p9)
}
  0x32   :  { %46 = dma.hbm_to_vmem [thread:$0]  %s672_s2, 2048, %s41_s10, [#allocation6], %s566_s28, %s566_s28, %s567_s29  }
  0x33   :  { %559 = dma.done.wait [#allocation3], 256  }
  0x34   :  { %560 = vsyncadd [#allocation3], 4294967040 }
  0x35   :  { %561 = dma.done.wait [#allocation6], 6144  }
  0x36   :  { %562 = vsyncadd [#allocation6], 4294961152  ;;  %v78_v0 = vld [vmem:[#allocation5 + $0x80] sm:$0xff]  ;;  %v79_v1 = vld [vmem:[#allocation5 + $0x88] sm:$0xff]  ;;  %v570_v53 = vmov 0.0|0.0   ;;  %vm571_vm0 = vmmov 0  }
  0x37   :  { %v62_v2 = vld [vmem:[#allocation5] sm:$0xff]  ;;  %v404_v3 = vpack.c.bf16 %v79_v1, %v78_v0  ;;  %v63_v4 = vld [vmem:[#allocation5 + $0x8] sm:$0xff]  ;;  %v80_v5 = vld [vmem:[#allocation5 + $0x90] sm:$0xff]  ;;  %436 = vmatprep.subr.bf16.mxu1 %v570_v53  ;;  %v572_v59 = vmov 0.0   ;;  %s573_s11 = smov [#allocation8]  }
  0x38   :  { %v81_v6 = vld [vmem:[#allocation5 + $0x98] sm:$0xff]  ;;  %v406_v7 = vpack.c.bf16 %v63_v4, %v62_v2  ;;  %v64_v9 = vld [vmem:[#allocation5 + $0x10] sm:$0xff]  ;;  %v82_v11 = vld [vmem:[#allocation5 + $0xa0] sm:$0xff]  ;;  %401 = vmatprep.mubr.msk.f32.mxu1 %vm571_vm0, %v572_v59  ;;  %s305_s12 = sshll.u32 %s573_s11, 4  ;;  %s306_s12 = int_to_ptr.vmem [resolvable:$true] %s305_s12 }
  0x39   :  { %v408_v8 = vpack.c.bf16 %v81_v6, %v80_v5  ;;  %v65_v10 = vld [vmem:[#allocation5 + $0x18] sm:$0xff]  ;;  %405 = vmatprep.subr.bf16.mxu0 %v404_v3  ;;  %v83_v12 = vld [vmem:[#allocation5 + $0xa8] sm:$0xff]  ;;  %v66_v15 = vld [vmem:[#allocation5 + $0x20] sm:$0xff]  ;;  %s537_s13 = scalar_lea.vmem %s306_s12, 128  ;;  %p542_p11 = scmp.lt.s32.totalorder %s306_s12, %s306_s12 }
  0x3a   :  { %407 = vmatpush3.bf16.msra.mxu0 %v406_v7  ;;  %v410_v13 = vpack.c.bf16 %v65_v10, %v64_v9  ;;  %v412_v14 = vpack.c.bf16 %v83_v12, %v82_v11  ;;  %v67_v16 = vld [vmem:[#allocation5 + $0x28] sm:$0xff]  ;;  %v84_v17 = vld [vmem:[#allocation5 + $0xb0] sm:$0xff]  ;;  %v85_v18 = vld [vmem:[#allocation5 + $0xb8] sm:$0xff]  ;;  %p538_p10 = scmp.ne.s32.totalorder %s306_s12, %s537_s13  ;;  %p543_p12 = scmp.lt.s32.totalorder %s537_s13, %s537_s13 }
  0x3b   :  { %409 = vmatprep.subr.bf16.mxu0 %v408_v8  ;;  %v414_v19 = vpack.c.bf16 %v67_v16, %v66_v15  ;;  %v416_v20 = vpack.c.bf16 %v85_v18, %v84_v17  ;;  %v68_v21 = vld [vmem:[#allocation5 + $0x30] sm:$0xff]  ;;  %v69_v22 = vld [vmem:[#allocation5 + $0x38] sm:$0xff]  ;;  %v86_v23 = vld [vmem:[#allocation5 + $0xc0] sm:$0xff] }
  0x3c   :  { %v87_v24 = vld [vmem:[#allocation5 + $0xc8] sm:$0xff]  ;;  %v61_v25 = vld [vmem:[#allocation2 + $0x8] sm:$0xff]  ;;  %v418_v26 = vpack.c.bf16 %v69_v22, %v68_v21  ;;  %v70_v28 = vld [vmem:[#allocation5 + $0x40] sm:$0xff]  ;;  %p544_p13 = por %p543_p12, %p542_p11 }
  0x3d   :  { %165 = vmatprep.mubr.f32.mxu0 %v61_v25  ;;  %v420_v27 = vpack.c.bf16 %v87_v24, %v86_v23  ;;  %v71_v29 = vld [vmem:[#allocation5 + $0x48] sm:$0xff]  ;;  %v88_v30 = vld [vmem:[#allocation5 + $0xd0] sm:$0xff]  ;;  %v89_v31 = vld [vmem:[#allocation5 + $0xd8] sm:$0xff] }
  0x3e   :  { %411 = vmatpush3.bf16.msra.mxu0 %v410_v13  ;;  %v422_v32 = vpack.c.bf16 %v71_v29, %v70_v28  ;;  %v424_v33 = vpack.c.bf16 %v89_v31, %v88_v30  ;;  %v72_v34 = vld [vmem:[#allocation5 + $0x50] sm:$0xff]  ;;  %v73_v35 = vld [vmem:[#allocation5 + $0x58] sm:$0xff]  ;;  %v90_v36 = vld [vmem:[#allocation5 + $0xe0] sm:$0xff]  ;;  %p545_p0 = pnand %p544_p13, %p538_p10 }
  0x3f   :  { %413 = vmatprep.subr.bf16.mxu0 %v412_v14  ;;  %v91_v37 = vld [vmem:[#allocation5 + $0xe8] sm:$0xff]  ;;  %v426_v38 = vpack.c.bf16 %v73_v35, %v72_v34  ;;  %v74_v40 = vld [vmem:[#allocation5 + $0x60] sm:$0xff]  ;;  %v92_v42 = vld [vmem:[#allocation5 + $0xf0] sm:$0xff] }
  0x40   :  { %v428_v39 = vpack.c.bf16 %v91_v37, %v90_v36  ;;  %v75_v41 = vld [vmem:[#allocation5 + $0x68] sm:$0xff]  ;;  %v93_v43 = vld [vmem:[#allocation5 + $0xf8] sm:$0xff]  ;;  %v76_v46 = vld [vmem:[#allocation5 + $0x70] sm:$0xff]  ;;  %v195_v37 = vlaneseq }
  0x41   :  { %v430_v44 = vpack.c.bf16 %v75_v41, %v74_v40  ;;  %v432_v45 = vpack.c.bf16 %v93_v43, %v92_v42  ;;  %v77_v47 = vld [vmem:[#allocation5 + $0x78] sm:$0xff]  ;;  %v60_v49 = vld [vmem:[#allocation2] sm:$0xff]  ;;  %v205_v50 = vld [vmem:[#allocation7] sm:$0xff] }
  0x42   :  { %415 = vmatpush3.bf16.msra.mxu0 %v414_v19  ;;  %v434_v48 = vpack.c.bf16 %v77_v47, %v76_v46  ;;  %v206_v51 = vld [vmem:[#allocation7 + $0x8] sm:$0xff]  ;;  %v207_v54 = vld [vmem:[#allocation7 + $0x10] sm:$0xff]  ;;  %v208_v55 = vld [vmem:[#allocation7 + $0x18] sm:$0xff] }
  0x43   :  { %417 = vmatprep.subr.bf16.mxu0 %v416_v20  ;;  %v437_v52 = vpack.c.bf16 %v206_v51, %v205_v50  ;;  %v440_v56 = vpack.c.bf16 %v208_v55, %v207_v54  ;;  %v209_v57 = vld [vmem:[#allocation7 + $0x20] sm:$0xff]  ;;  %v210_v58 = vld [vmem:[#allocation7 + $0x28] sm:$0xff]  ;;  %v211_v61 = vld [vmem:[#allocation7 + $0x30] sm:$0xff] }
  0x44   :  { %v443_v60 = vpack.c.bf16 %v210_v58, %v209_v57  ;;  %v212_v62 = vld [vmem:[#allocation7 + $0x38] sm:$0xff]  ;;  %v213_v0 = vld [vmem:[#allocation7 + $0x40] sm:$0xff]  ;;  %v214_v1 = vld [vmem:[#allocation7 + $0x48] sm:$0xff] }
  0x45   :  { %438 = vmatpush3.bf16.msra.mxu1 %v437_v52  ;;  %v446_v63 = vpack.c.bf16 %v212_v62, %v211_v61  ;;  %v449_v2 = vpack.c.bf16 %v214_v1, %v213_v0  ;;  %v215_v3 = vld [vmem:[#allocation7 + $0x50] sm:$0xff]  ;;  %v216_v4 = vld [vmem:[#allocation7 + $0x58] sm:$0xff]  ;;  %v217_v6 = vld [vmem:[#allocation7 + $0x60] sm:$0xff] }
  0x46   :  { %419 = vmatpush3.bf16.msra.mxu0 %v418_v26  ;;  %439 = vmatprep.subr.bf16.mxu1 %v570_v53  ;;  %v452_v5 = vpack.c.bf16 %v216_v4, %v215_v3  ;;  %v218_v7 = vld [vmem:[#allocation7 + $0x68] sm:$0xff]  ;;  %v219_v9 = vld [vmem:[#allocation7 + $0x70] sm:$0xff]  ;;  %v220_v10 = vld [vmem:[#allocation7 + $0x78] sm:$0xff] }
  0x47   :  { %421 = vmatprep.subr.bf16.mxu0 %v420_v27  ;;  %v455_v8 = vpack.c.bf16 %v218_v7, %v217_v6  ;;  %v458_v11 = vpack.c.bf16 %v220_v10, %v219_v9  ;;  %v315_v13 = vld [vmem:[%s673_s3] ss:$0 sm:$0xff]  ;;  %v96_v43 = vld [vmem:[%s673_s3 + $0x2] sm:$0x1] }
  0x48   :  { %v316_v50 = vld [vmem:[%s674_s4] ss:$0 sm:$0xff] }
  0x49   :  { %441 = vmatpush3.bf16.msra.mxu1 %v440_v56 }
  0x4a   :  { %423 = vmatpush3.bf16.msra.mxu0 %v422_v32  ;;  %442 = vmatprep.subr.bf16.mxu1 %v570_v53 }
  0x4b   :  { %425 = vmatprep.subr.bf16.mxu0 %v424_v33 }
  0x4d   :  { %444 = vmatpush3.bf16.msra.mxu1 %v443_v60 }
  0x4e   :  { %427 = vmatpush3.bf16.msra.mxu0 %v426_v38  ;;  %445 = vmatprep.subr.bf16.mxu1 %v570_v53  ;;  %v196_v38 = vshrl.u32 %v195_v37, 7 }
  0x4f   :  { %429 = vmatprep.subr.bf16.mxu0 %v428_v39  ;;  %v95_v39 = vld [vmem:[%s673_s3 + $0x1] sm:$0x1] }
  0x50   :  { %v197_v40 = vsub.s32 0, %v196_v38 }
  0x51   :  { %447 = vmatpush3.bf16.msra.mxu1 %v446_v63 }
  0x52   :  { %431 = vmatpush3.bf16.msra.mxu0 %v430_v44  ;;  %448 = vmatprep.subr.bf16.mxu1 %v570_v53 }
  0x53   :  { %433 = vmatprep.subr.bf16.mxu0 %v432_v45 }
  0x55   :  { %450 = vmatpush3.bf16.msra.mxu1 %v449_v2 }
  0x56   :  { %435 = vmatpush3.bf16.msra.mxu0 %v434_v48  ;;  %451 = vmatprep.subr.bf16.mxu1 %v570_v53 }
  0x59   :  { %166 = vmatmul.mubr.f32.vlgmr.msra.gmra.mrb[0].mxu0 %v60_v49  ;;  %453 = vmatpush3.bf16.msra.mxu1 %v452_v5 }
  0x5a   :  { %454 = vmatprep.subr.bf16.mxu1 %v570_v53 }
  0x5d   :  { %456 = vmatpush3.bf16.msra.mxu1 %v455_v8 }
  0x5e   :  { %457 = vmatprep.subr.bf16.mxu1 %v570_v53 }
  0x61   :  { %459 = vmatpush3.bf16.msra.mxu1 %v458_v11 }
 0x12c   :  { %v349_v12 = vpop.f32.mrb[0].mxu0 }
 0x12d   :  { %v350_v14 = vpop.f32.mrb[1].mxu0 }
 0x12e   :  { %v351_v15 = vadd.f32 %v350_v14, %v349_v12 }
 0x130   :  { %v168_v16 = vadd.f32 %v351_v15, %v315_v13 }
 0x132   :  { %v171_v17 = vmax.f32 %v168_v16, 0.0 }
 0x134   :  { %v172_v18 = vrot.slane %v171_v17, 4  ;;  %v178_v19 = vmul.f32 %v171_v17, %v171_v17 }
 0x136   :  { %v173_v20 = vadd.f32 %v172_v18, %v171_v17  ;;  %v179_v21 = vrot.slane %v178_v19, 4 }
 0x138   :  { %v174_v22 = vrot.slane %v173_v20, 2  ;;  %v180_v23 = vadd.f32 %v179_v21, %v178_v19 }
 0x13a   :  { %v175_v24 = vadd.f32 %v174_v22, %v173_v20  ;;  %v181_v25 = vrot.slane %v180_v23, 2 }
 0x13c   :  { %v182_v26 = vadd.f32 %v181_v25, %v180_v23  ;;  %v176_v27 = vrot.slane %v175_v24, 1 }
 0x13e   :  { %v183_v28 = vrot.slane %v182_v26, 1  ;;  %v177_v29 = vadd.f32 %v176_v27, %v175_v24 }
 0x140   :  { %v184_v30 = vadd.f32 %v183_v28, %v182_v26  ;;  %v185_v31 = vmul.f32 0.125, %v177_v29 }
 0x142   :  { %v186_v32 = vmul.f32 0.125, %v184_v30  ;;  %v187_v33 = vmul.f32 %v185_v31, %v185_v31 }
 0x144   :  { %v188_v34 = vsub.f32 %v186_v32, %v187_v33 }
 0x146   :  { %v189_v35 = vmax.f32 %v188_v34, 0.0 }
 0x148   :  { %v190_v36 = vadd.f32 1e-05, %v189_v35 }
 0x14a   :  { %469 = vrsqrt.f32 %v190_v36 }
 0x154   :  { %v470_v41 = vpop.eup %469 }
 0x155   :  { %v192_v42 = vmul.f32 %v470_v41, %v95_v39 }
 0x157   :  { %v193_v44 = vmul.f32 %v192_v42, %v185_v31  ;;  %v198_v45 = vrot.slane %v192_v42, %v197_v40 }
 0x159   :  { %v194_v46 = vsub.f32 %v96_v43, %v193_v44  ;;  %v199_v47 = vmul.f32 %v198_v45, %v171_v17 }
 0x15b   :  { %v203_v48 = vrot.slane %v194_v46, %v197_v40 }
 0x15d   :  { %v204_v49 = vadd.f32 %v203_v48, %v199_v47 }
 0x15f   :  { %402 = vmatmul.mubr.f32.vlgmr.msra.gmra.mrb[0].mxu1 %v204_v49 }
 0x232   :  { %v294_v51 = vpop.f32.mrb[0].mxu1 }
 0x233   :  { %v295_v52 = vadd.f32 %v316_v50, %v294_v51  ;;  %v403_v53 = vpop.f32.mrb[1].mxu1 }
 0x235   :  { %298 = vst [vmem:[#allocation8] sm:$0xff] %v295_v52 }
 0x236   :  { %548 = shalt.err (!%p545_p0)
}
 0x237   :  { %s549_s15 = scalar_lea.hbm %s675_s5, 128 }
 0x238   :  { %p550_p1 = scmp.ne.s32.totalorder %s675_s5, %s549_s15  ;;  %p553_p2 = scmp.lt.u32.totalorder %s549_s15, %s675_s5 }
 0x23a   :  { %p555_p3 = pnand %p553_p2, %p550_p1 }
 0x23c   :  { %558 = shalt.err (!%p555_p3)
}
 0x23d   :  { %308 = dma.vmem_to_hbm [thread:$0]  %s306_s12, 128, %s675_s5, [#allocation4]  }
 0x23e   :  { %563 = dma.done.wait [#allocation4], 128  }
 0x23f   :  { %564 = vsyncadd [#allocation4], 4294967168 }
 0x240   :  { %312 = vsyncpa [#allocation3], 1 }
 0x241   :  { %313 = vsyncpa [#allocation6], 1 }
 0x242   :  { %314 = vsyncpa [#allocation4], 1 }

</bundles_post_ra>
